<compile_context>
chip_gen: v7x
topology: tpu7x:2x2x1
jax: 0.10.0
libtpu: 0.0.40
codegen_flags: <defaults>
</compile_context>

<pallas_src>
import math

import jax
import jax.numpy as jnp
from jax import lax
from jax.experimental import pallas as pl
from jax.experimental.pallas import tpu as pltpu


def _round_up(x, m):
    return (x + m - 1) // m * m


# ---------------------------------------------------------------------------
# MLM prediction head kernel (transform + decoder)
# ---------------------------------------------------------------------------
def _mlm_head_kernel(seq_ref, w1_ref, b1_ref, gamma_ref, beta_ref,
                     w2_ref, b2_ref, out_ref, h_scratch):
    # Grid: (row tiles, vocab tiles); vocab is the innermost axis, so the
    # transform is computed once per row tile (at j == 0) and cached in VMEM.
    @pl.when(pl.program_id(1) == 0)
    def _():
        x = seq_ref[...].astype(jnp.float32)
        # dense (H -> H) + bias
        h = jnp.dot(x, w1_ref[...], preferred_element_type=jnp.float32) + b1_ref[...]
        # exact GELU (erf form), matching HF ACT2FN["gelu"]
        h = 0.5 * h * (1.0 + lax.erf(h * (1.0 / math.sqrt(2.0))))
        # LayerNorm over hidden dim, eps = 1e-12
        mu = jnp.mean(h, axis=-1, keepdims=True)
        var = jnp.mean((h - mu) * (h - mu), axis=-1, keepdims=True)
        h = (h - mu) * lax.rsqrt(var + 1e-12)
        h = h * gamma_ref[...] + beta_ref[...]
        # bf16 scratch: halves VMEM and feeds the MXU at full bf16 rate.
        h_scratch[...] = h.astype(h_scratch.dtype)

    # decoder matmul (H -> vocab tile) + decoder bias, f32 accumulation.
    out_ref[...] = (
        jnp.dot(h_scratch[...], w2_ref[...], preferred_element_type=jnp.float32)
        + b2_ref[...]
    ).astype(out_ref.dtype)


def mlm_prediction_head(seq_flat, w1, b1, gamma, beta, w2, b2, *,
                        tile_m=512, tile_v=512):
    """seq_flat: (M, H) float32. Returns (M, V) float32 prediction scores."""
    M, H = seq_flat.shape
    V = w2.shape[1]

    # Row tiling: keep VMEM independent of M, keep sublane alignment (mult of 8).
    tm = min(tile_m, _round_up(M, 8))
    Mp = _round_up(M, tm)
    # Vocab tiling: pad V up to a multiple of tile_v (e.g. 30522 -> 30720).
    Vp = _round_up(V, tile_v)

    if Mp != M:
        seq_flat = jnp.pad(seq_flat, ((0, Mp - M), (0, 0)))

    w2_bf16 = w2.astype(jnp.bfloat16)
    if Vp != V:
        w2_bf16 = jnp.pad(w2_bf16, ((0, 0), (0, Vp - V)))
        b2 = jnp.pad(b2, ((0, 0), (0, Vp - V)))

    grid = (Mp // tm, Vp // tile_v)

    out = pl.pallas_call(
        _mlm_head_kernel,
        out_shape=jax.ShapeDtypeStruct((Mp, Vp), jnp.float32),
        grid_spec=pltpu.PrefetchScalarGridSpec(
            num_scalar_prefetch=0,
            grid=grid,
            in_specs=[
                pl.BlockSpec((tm, H), lambda i, j: (i, 0)),       # sequence rows
                pl.BlockSpec((H, H), lambda i, j: (0, 0)),        # dense weight
                pl.BlockSpec((1, H), lambda i, j: (0, 0)),        # dense bias
                pl.BlockSpec((1, H), lambda i, j: (0, 0)),        # LN gamma
                pl.BlockSpec((1, H), lambda i, j: (0, 0)),        # LN beta
                pl.BlockSpec((H, tile_v), lambda i, j: (0, j)),   # decoder weight (bf16)
                pl.BlockSpec((1, tile_v), lambda i, j: (0, j)),   # decoder bias
            ],
            out_specs=pl.BlockSpec((tm, tile_v), lambda i, j: (i, j)),
            scratch_shapes=[pltpu.VMEM((tm, H), jnp.bfloat16)],
        ),
        compiler_params=pltpu.CompilerParams(
            dimension_semantics=("parallel", "arbitrary"),
            vmem_limit_bytes=32 * 1024 * 1024,
        ),
    )(seq_flat, w1, b1, gamma, beta, w2_bf16, b2)

    if Mp != M or Vp != V:
        out = out[:M, :V]
    return out


# ---------------------------------------------------------------------------
# NSP head kernel (pooled_output -> num_labels logits)
# ---------------------------------------------------------------------------
def _nsp_head_kernel(pooled_ref, w_ref, b_ref, out_ref):
    out_ref[...] = (
        jnp.dot(pooled_ref[...], w_ref[...], preferred_element_type=jnp.float32)
        + b_ref[...]
    ).astype(out_ref.dtype)


def nsp_head(pooled, w, b):
    """pooled: (B, H). Returns (B, num_labels)."""
    B, H = pooled.shape
    L = w.shape[1]
    return pl.pallas_call(
        _nsp_head_kernel,
        out_shape=jax.ShapeDtypeStruct((B, L), jnp.float32),
        in_specs=[
            pl.BlockSpec((B, H), lambda: (0, 0)),
            pl.BlockSpec((H, L), lambda: (0, 0)),
            pl.BlockSpec((1, L), lambda: (0, 0)),
        ],
        out_specs=pl.BlockSpec((B, L), lambda: (0, 0)),
    )(pooled, w, b)


# ---------------------------------------------------------------------------
# Full module forward
# ---------------------------------------------------------------------------
def bert_pretraining_heads(sequence_output, pooled_output, params):
    B, S, H = sequence_output.shape
    seq_flat = sequence_output.reshape(B * S, H)
    scores_flat = mlm_prediction_head(
        seq_flat,
        params["transform_dense_w"], params["transform_dense_b"],
        params["ln_gamma"], params["ln_beta"],
        params["decoder_w"], params["decoder_b"],
    )
    prediction_scores = scores_flat.reshape(B, S, -1)
    seq_relationship_score = nsp_head(
        pooled_output, params["nsp_w"], params["nsp_b"])
    return prediction_scores, seq_relationship_score


# ---------------------------------------------------------------------------
# Pure-JAX reference for validation
# ---------------------------------------------------------------------------
def reference(sequence_output, pooled_output, params):
    h = sequence_output @ params["transform_dense_w"] + params["transform_dense_b"][0]
    h = 0.5 * h * (1.0 + lax.erf(h / jnp.sqrt(2.0)))
    mu = jnp.mean(h, axis=-1, keepdims=True)
    var = jnp.mean((h - mu) ** 2, axis=-1, keepdims=True)
    h = (h - mu) * lax.rsqrt(var + 1e-12)
    h = h * params["ln_gamma"][0] + params["ln_beta"][0]
    pred = h @ params["decoder_w"] + params["decoder_b"][0]
    nsp = pooled_output @ params["nsp_w"] + params["nsp_b"][0]
    return pred, nsp


if __name__ == "__main__":
    # Small, config-consistent shapes (scaled-down MyBertConfig).
    # V = 500 deliberately NOT a multiple of tile_v to exercise the padding path.
    B, S, H, V, L = 2, 8, 32, 500, 2

    key = jax.random.PRNGKey(0)
    ks = jax.random.split(key, 6)
    init = 0.02  # initializer_range

    params = {
        # MyBertPredictionHeadTransform.dense (H -> H)
        "transform_dense_w": init * jax.random.normal(ks[0], (H, H), jnp.float32),
        "transform_dense_b": jnp.zeros((1, H), jnp.float32),
        # LayerNorm
        "ln_gamma": jnp.ones((1, H), jnp.float32),
        "ln_beta": jnp.zeros((1, H), jnp.float32),
        # decoder (H -> vocab), bias is a separate zero-init parameter
        "decoder_w": init * jax.random.normal(ks[1], (H, V), jnp.float32),
        "decoder_b": jnp.zeros((1, V), jnp.float32),
        # seq_relationship (H -> num_labels)
        "nsp_w": init * jax.random.normal(ks[2], (H, L), jnp.float32),
        "nsp_b": jnp.zeros((1, L), jnp.float32),
    }

    sequence_output = jax.random.normal(ks[3], (B, S, H), jnp.float32)
    pooled_output = jax.random.normal(ks[4], (B, H), jnp.float32)

    pred_scores, nsp_scores = jax.block_until_ready(
        bert_pretraining_heads(sequence_output, pooled_output, params))

    ref_pred, ref_nsp = reference(sequence_output, pooled_output, params)

    assert pred_scores.shape == (B, S, V)
    assert nsp_scores.shape == (B, L)
    # Decoder matmul uses bf16 inputs with f32 accumulation -> relaxed tolerance.
    assert jnp.allclose(pred_scores, ref_pred, atol=1e-2, rtol=1e-2)
    assert jnp.allclose(nsp_scores, ref_nsp, atol=1e-4, rtol=1e-4)

    print("KERNEL_OK")
</pallas_src>

<mosaic_0001>
module attributes {stable_mosaic.version = 11 : i64} {
  func.func @_mlm_head_kernel(%arg0: i32, %arg1: i32, %arg2: memref<16x32xf32, #tpu.memory_space<vmem>>, %arg3: memref<32x32xf32, #tpu.memory_space<vmem>>, %arg4: memref<1x32xf32, #tpu.memory_space<vmem>>, %arg5: memref<1x32xf32, #tpu.memory_space<vmem>>, %arg6: memref<1x32xf32, #tpu.memory_space<vmem>>, %arg7: memref<32x512xbf16, #tpu.memory_space<vmem>>, %arg8: memref<1x512xf32, #tpu.memory_space<vmem>>, %arg9: memref<16x512xf32, #tpu.memory_space<vmem>>, %arg10: memref<16x32xbf16, #tpu.memory_space<vmem>>) attributes {dimension_semantics = [#tpu.dimension_semantics<parallel>, #tpu.dimension_semantics<arbitrary>], iteration_bounds = array<i64: 1, 1>, scalar_prefetch = 0 : i64, scratch_operands = 1 : i64, tpu.core_type = #tpu.core_type<tc>, window_params = [{transform_indices = @transform_0, window_bounds = array<i64: 16, 32>}, {pipeline_mode = #tpu.pipeline_mode<synchronous>, transform_indices = @transform_1, window_bounds = array<i64: 32, 32>}, {pipeline_mode = #tpu.pipeline_mode<synchronous>, transform_indices = @transform_2, window_bounds = array<i64: 1, 32>}, {pipeline_mode = #tpu.pipeline_mode<synchronous>, transform_indices = @transform_3, window_bounds = array<i64: 1, 32>}, {pipeline_mode = #tpu.pipeline_mode<synchronous>, transform_indices = @transform_4, window_bounds = array<i64: 1, 32>}, {transform_indices = @transform_5, window_bounds = array<i64: 32, 512>}, {transform_indices = @transform_6, window_bounds = array<i64: 1, 512>}, {transform_indices = @transform_7, window_bounds = array<i64: 16, 512>}]} {
    %c0_i32 = arith.constant 0 : i32
    %0 = arith.cmpi eq, %arg1, %c0_i32 : i32
    %1 = arith.extui %0 : i1 to i32
    %c0_i32_0 = arith.constant 0 : i32
    %2 = arith.cmpi ne, %1, %c0_i32_0 : i32
    scf.if %2 {
      %c0_8 = arith.constant 0 : index
      %c0_9 = arith.constant 0 : index
      %10 = vector.load %arg2[%c0_8, %c0_9] : memref<16x32xf32, #tpu.memory_space<vmem>>, vector<16x32xf32>
      %c0_10 = arith.constant 0 : index
      %c0_11 = arith.constant 0 : index
      %11 = vector.load %arg3[%c0_10, %c0_11] : memref<32x32xf32, #tpu.memory_space<vmem>>, vector<32x32xf32>
      %cst_12 = arith.constant dense<0.000000e+00> : vector<16x32xf32>
      %12 = tpu.matmul %10, %11, %cst_12 {dimension_numbers = #tpu.dot_dimension_numbers<[1], [0], [0], [1], [0, 0, 1, 1], [], []>} : vector<16x32xf32>, vector<32x32xf32>, vector<16x32xf32> -> vector<16x32xf32>
      %c0_13 = arith.constant 0 : index
      %c0_14 = arith.constant 0 : index
      %13 = vector.load %arg4[%c0_13, %c0_14] : memref<1x32xf32, #tpu.memory_space<vmem>>, vector<1x32xf32>
      %14 = vector.broadcast %13 : vector<1x32xf32> to vector<16x32xf32>
      %15 = arith.addf %12, %14 : vector<16x32xf32>
      %cst_15 = arith.constant 5.000000e-01 : f32
      %16 = vector.broadcast %cst_15 : f32 to vector<16x32xf32>
      %17 = arith.mulf %16, %15 : vector<16x32xf32>
      %cst_16 = arith.constant 0.707106769 : f32
      %18 = vector.broadcast %cst_16 : f32 to vector<16x32xf32>
      %19 = arith.mulf %15, %18 : vector<16x32xf32>
      %20 = math.erf %19 : vector<16x32xf32>
      %cst_17 = arith.constant 1.000000e+00 : f32
      %21 = vector.broadcast %cst_17 : f32 to vector<16x32xf32>
      %22 = arith.addf %21, %20 : vector<16x32xf32>
      %23 = arith.mulf %17, %22 : vector<16x32xf32>
      %cst_18 = arith.constant dense<0.000000e+00> : vector<16xf32>
      %24 = vector.multi_reduction <add>, %23, %cst_18 [1] : vector<16x32xf32> to vector<16xf32>
      %25 = vector.shape_cast %24 : vector<16xf32> to vector<16x1xf32>
      %cst_19 = arith.constant 3.200000e+01 : f32
      %26 = vector.broadcast %cst_19 : f32 to vector<16x1xf32>
      %27 = arith.divf %25, %26 : vector<16x1xf32>
      %28 = vector.broadcast %27 : vector<16x1xf32> to vector<16x32xf32>
      %29 = arith.subf %23, %28 : vector<16x32xf32>
      %30 = vector.broadcast %27 : vector<16x1xf32> to vector<16x32xf32>
      %31 = arith.subf %23, %30 : vector<16x32xf32>
      %32 = arith.mulf %29, %31 : vector<16x32xf32>
      %cst_20 = arith.constant dense<0.000000e+00> : vector<16xf32>
      %33 = vector.multi_reduction <add>, %32, %cst_20 [1] : vector<16x32xf32> to vector<16xf32>
      %34 = vector.shape_cast %33 : vector<16xf32> to vector<16x1xf32>
      %cst_21 = arith.constant 3.200000e+01 : f32
      %35 = vector.broadcast %cst_21 : f32 to vector<16x1xf32>
      %36 = arith.divf %34, %35 : vector<16x1xf32>
      %37 = vector.broadcast %27 : vector<16x1xf32> to vector<16x32xf32>
      %38 = arith.subf %23, %37 : vector<16x32xf32>
      %cst_22 = arith.constant 9.99999996E-13 : f32
      %39 = vector.broadcast %cst_22 : f32 to vector<16x1xf32>
      %40 = arith.addf %36, %39 : vector<16x1xf32>
      %41 = math.rsqrt %40 : vector<16x1xf32>
      %42 = vector.broadcast %41 : vector<16x1xf32> to vector<16x32xf32>
      %43 = arith.mulf %38, %42 : vector<16x32xf32>
      %c0_23 = arith.constant 0 : index
      %c0_24 = arith.constant 0 : index
      %44 = vector.load %arg5[%c0_23, %c0_24] : memref<1x32xf32, #tpu.memory_space<vmem>>, vector<1x32xf32>
      %45 = vector.broadcast %44 : vector<1x32xf32> to vector<16x32xf32>
      %46 = arith.mulf %43, %45 : vector<16x32xf32>
      %c0_25 = arith.constant 0 : index
      %c0_26 = arith.constant 0 : index
      %47 = vector.load %arg6[%c0_25, %c0_26] : memref<1x32xf32, #tpu.memory_space<vmem>>, vector<1x32xf32>
      %48 = vector.broadcast %47 : vector<1x32xf32> to vector<16x32xf32>
      %49 = arith.addf %46, %48 : vector<16x32xf32>
      %50 = arith.truncf %49 : vector<16x32xf32> to vector<16x32xbf16>
      %c0_27 = arith.constant 0 : index
      %c0_28 = arith.constant 0 : index
      %51 = vector.load %arg10[%c0_27, %c0_28] : memref<16x32xbf16, #tpu.memory_space<vmem>>, vector<16x32xbf16>
      tpu.vector_store %arg10[%c0_27, %c0_28], %50 {strides = array<i32>} : memref<16x32xbf16, #tpu.memory_space<vmem>>, vector<16x32xbf16>,
    } else {
    }
    %c0 = arith.constant 0 : index
    %c0_1 = arith.constant 0 : index
    %3 = vector.load %arg10[%c0, %c0_1] : memref<16x32xbf16, #tpu.memory_space<vmem>>, vector<16x32xbf16>
    %c0_2 = arith.constant 0 : index
    %c0_3 = arith.constant 0 : index
    %4 = vector.load %arg7[%c0_2, %c0_3] : memref<32x512xbf16, #tpu.memory_space<vmem>>, vector<32x512xbf16>
    %cst = arith.constant dense<0.000000e+00> : vector<16x512xf32>
    %5 = tpu.matmul %3, %4, %cst {dimension_numbers = #tpu.dot_dimension_numbers<[1], [0], [0], [1], [0, 0, 1, 1], [], []>} : vector<16x32xbf16>, vector<32x512xbf16>, vector<16x512xf32> -> vector<16x512xf32>
    %c0_4 = arith.constant 0 : index
    %c0_5 = arith.constant 0 : index
    %6 = vector.load %arg8[%c0_4, %c0_5] : memref<1x512xf32, #tpu.memory_space<vmem>>, vector<1x512xf32>
    %7 = vector.broadcast %6 : vector<1x512xf32> to vector<16x512xf32>
    %8 = arith.addf %5, %7 : vector<16x512xf32>
    %c0_6 = arith.constant 0 : index
    %c0_7 = arith.constant 0 : index
    %9 = vector.load %arg9[%c0_6, %c0_7] : memref<16x512xf32, #tpu.memory_space<vmem>>, vector<16x512xf32>
    tpu.vector_store %arg9[%c0_6, %c0_7], %8 {strides = array<i32>} : memref<16x512xf32, #tpu.memory_space<vmem>>, vector<16x512xf32>,
    return
  }
  func.func @transform_0(%arg0: i32, %arg1: i32) -> (i32, i32) {
    %c0_i32 = arith.constant 0 : i32
    %c0_i32_0 = arith.constant 0 : i32
    return %arg0, %c0_i32 : i32, i32
  }
  func.func @transform_1(%arg0: i32, %arg1: i32) -> (i32, i32) {
    %c0_i32 = arith.constant 0 : i32
    %c0_i32_0 = arith.constant 0 : i32
    %c0_i32_1 = arith.constant 0 : i32
    return %c0_i32, %c0_i32_0 : i32, i32
  }
  func.func @transform_2(%arg0: i32, %arg1: i32) -> (i32, i32) {
    %c0_i32 = arith.constant 0 : i32
    %c0_i32_0 = arith.constant 0 : i32
    %c0_i32_1 = arith.constant 0 : i32
    return %c0_i32, %c0_i32_0 : i32, i32
  }
  func.func @transform_3(%arg0: i32, %arg1: i32) -> (i32, i32) {
    %c0_i32 = arith.constant 0 : i32
    %c0_i32_0 = arith.constant 0 : i32
    %c0_i32_1 = arith.constant 0 : i32
    return %c0_i32, %c0_i32_0 : i32, i32
  }
  func.func @transform_4(%arg0: i32, %arg1: i32) -> (i32, i32) {
    %c0_i32 = arith.constant 0 : i32
    %c0_i32_0 = arith.constant 0 : i32
    %c0_i32_1 = arith.constant 0 : i32
    return %c0_i32, %c0_i32_0 : i32, i32
  }
  func.func @transform_5(%arg0: i32, %arg1: i32) -> (i32, i32) {
    %c0_i32 = arith.constant 0 : i32
    %c0_i32_0 = arith.constant 0 : i32
    return %c0_i32, %arg1 : i32, i32
  }
  func.func @transform_6(%arg0: i32, %arg1: i32) -> (i32, i32) {
    %c0_i32 = arith.constant 0 : i32
    %c0_i32_0 = arith.constant 0 : i32
    return %c0_i32, %arg1 : i32, i32
  }
  func.func @transform_7(%arg0: i32, %arg1: i32) -> (i32, i32) {
    %c0_i32 = arith.constant 0 : i32
    return %arg0, %arg1 : i32, i32
  }
}

</mosaic_0001>

<bundles_post_ra>
// kernel: tpu_custom_call.1
= control target key start
LH: loop header
LB: loop body
LE: loop exit
PB: predicated region body
PF: predicated region fallthrough
CT: control target
= control target key end

     0   :  { %12 = vsyncpa [#allocation4], 0  ;;  %s704_s0 = inlined_call_operand.hbm [shape: f32[16,32], index: 0, kind: input, shape index: {}]   ;;  %s705_s1 = inlined_call_operand.hbm [shape: f32[32,32], index: 1, kind: input, shape index: {}]   ;;  %s706_s2 = inlined_call_operand.vmem [shape: f32[1,32], index: 2, kind: input, shape index: {}]   ;;  %s707_s3 = inlined_call_operand.vmem [shape: f32[1,32], index: 3, kind: input, shape index: {}]   ;;  %s708_s4 = inlined_call_operand.vmem [shape: f32[1,32], index: 4, kind: input, shape index: {}]   ;;  %s709_s5 = inlined_call_operand.hbm [shape: bf16[32,512], index: 5, kind: input, shape index: {}]   ;;  %s710_s6 = inlined_call_operand.vmem [shape: f32[1,512], index: 6, kind: input, shape index: {}]   ;;  %s711_s7 = inlined_call_operand.hbm [shape: f32[16,512], index: 7, kind: output, shape index: {}]  }
   0x1   :  { %13 = vsyncpa [#allocation7], 0 }
   0x2   :  { %14 = vsyncpa [#allocation5], 0  ;;  %s577_s24 = smov [#allocation6]   ;;  %s578_s26 = smov [#allocation3]  }
   0x3   :  { %s32_s25 = sshll.u32 %s577_s24, 4  ;;  %s20_s27 = sshll.u32 %s578_s26, 4  ;;  %s33_s25 = int_to_ptr.vmem [resolvable:$true] %s32_s25  ;;  %s628_s27 = int_to_ptr.vmem [resolvable:$true] %s20_s27 }
   0x4   :  { %s483_s30 = scalar_lea.hbm %s705_s1, 512 }
   0x5   :  { %p484_p0 = scmp.ne.s32.totalorder %s705_s1, %s483_s30  ;;  %p487_p1 = scmp.lt.u32.totalorder %s483_s30, %s705_s1 }
   0x7   :  { %p489_p2 = pnand %p487_p1, %p484_p0 }
   0x9   :  { %492 = shalt.err (!%p489_p2)
}
   0xa   :  { %s493_s12 = scalar_lea.vmem %s33_s25, 512  ;;  %p498_p4 = scmp.lt.s32.totalorder %s33_s25, %s33_s25 }
   0xb   :  { %p494_p3 = scmp.ne.s32.totalorder %s33_s25, %s493_s12  ;;  %p499_p5 = scmp.lt.s32.totalorder %s493_s12, %s493_s12 }
   0xd   :  { %p500_p6 = por %p499_p5, %p498_p4 }
   0xf   :  { %p501_p7 = pnand %p500_p6, %p494_p3 }
  0x11   :  { %504 = shalt.err (!%p501_p7)
}
  0x12   :  { %s579_s13 = smov 128   ;;  %s580_s14 = smov 8  }
  0x13   :  { %38 = dma.hbm_to_vmem [thread:$0]  %s705_s1, 512, %s33_s25, [#allocation7], %s579_s13, %s579_s13, %s580_s14  }
  0x14   :  { %s505_s19 = scalar_lea.hbm %s704_s0, 256 }
  0x15   :  { %p506_p8 = scmp.ne.s32.totalorder %s704_s0, %s505_s19  ;;  %p509_p9 = scmp.lt.u32.totalorder %s505_s19, %s704_s0 }
  0x17   :  { %p511_p10 = pnand %p509_p9, %p506_p8 }
  0x19   :  { %514 = shalt.err (!%p511_p10)
}
  0x1a   :  { %s515_s24 = scalar_lea.vmem %s628_s27, 256  ;;  %p520_p12 = scmp.lt.s32.totalorder %s628_s27, %s628_s27 }
  0x1b   :  { %p516_p11 = scmp.ne.s32.totalorder %s628_s27, %s515_s24  ;;  %p521_p13 = scmp.lt.s32.totalorder %s515_s24, %s515_s24 }
  0x1d   :  { %p522_p0 = por %p521_p13, %p520_p12 }
  0x1f   :  { %p523_p1 = pnand %p522_p0, %p516_p11 }
  0x21   :  { %526 = shalt.err (!%p523_p1)
}
  0x22   :  { %26 = dma.hbm_to_vmem [thread:$0]  %s704_s0, 256, %s628_s27, [#allocation4], %s579_s13, %s579_s13, %s580_s14  }
  0x23   :  { %s581_s26 = smov [#allocation8]   ;;  %s527_s8 = scalar_lea.hbm %s709_s5, 1024 }
  0x24   :  { %s50_s28 = sshll.u32 %s581_s26, 4  ;;  %p528_p2 = scmp.ne.s32.totalorder %s709_s5, %s527_s8  ;;  %s51_s28 = int_to_ptr.vmem [resolvable:$true] %s50_s28 }
  0x25   :  { %p531_p3 = scmp.lt.u32.totalorder %s527_s8, %s709_s5 }
  0x27   :  { %p533_p4 = pnand %p531_p3, %p528_p2 }
  0x29   :  { %536 = shalt.err (!%p533_p4)
}
  0x2a   :  { %s537_s15 = scalar_lea.vmem %s51_s28, 1024  ;;  %p542_p6 = scmp.lt.s32.totalorder %s51_s28, %s51_s28 }
  0x2b   :  { %p538_p5 = scmp.ne.s32.totalorder %s51_s28, %s537_s15  ;;  %p543_p7 = scmp.lt.s32.totalorder %s537_s15, %s537_s15 }
  0x2d   :  { %p544_p8 = por %p543_p7, %p542_p6 }
  0x2f   :  { %p545_p9 = pnand %p544_p8, %p538_p5 }
  0x31   :  { %548 = shalt.err (!%p545_p9)
}
  0x32   :  { %s582_s0 = smov 256   ;;  %s583_s27 = smov 16  }
  0x33   :  { %56 = dma.hbm_to_vmem [thread:$0]  %s709_s5, 1024, %s51_s28, [#allocation7], %s582_s0, %s582_s0, %s583_s27  }
  0x34   :  { %571 = dma.done.wait [#allocation4], 256  }
  0x35   :  { %572 = vsyncadd [#allocation4], 4294967040 }
  0x36   :  { %573 = dma.done.wait [#allocation7], 1536  }
  0x37   :  { %574 = vsyncadd [#allocation7], 4294965760  ;;  %vm86_vm0 = vcmask 261120   ;;  %v75_v0 = vld [vmem:[#allocation6] sm:$0xff]  ;;  %v76_v1 = vld [vmem:[#allocation6 + $0x8] sm:$0xff]  ;;  %v584_v43 = vmov 0   ;;  %v236_v62 = vlaneseq }
  0x38   :  { %v77_v2 = vld [vmem:[#allocation6 + $0x10] sm:$0xff]  ;;  %v444_v3 = vpack.c.bf16 %v76_v1, %v75_v0  ;;  %v78_v4 = vld [vmem:[#allocation6 + $0x18] sm:$0xff]  ;;  %v412_v8 = vld [vmem:[%s706_s2] ss:$0 sm:$0xff]  ;;  %332 = vmatprep.mubr.bf16.mxu1 %v584_v43 }
  0x39   :  { %v73_v5 = vld [vmem:[#allocation3] sm:$0xff]  ;;  %v448_v6 = vpack.c.bf16 %v78_v4, %v77_v2  ;;  %v74_v7 = vld [vmem:[#allocation3 + $0x8] sm:$0xff]  ;;  %v415_v52 = vld [vmem:[%s707_s3] ss:$0 sm:$0xff]  ;;  %v237_v63 = vshrl.u32 %v236_v62, 7 }
  0x3a   :  { %441 = vmatprep.mubr.msk.f32.mxu0 %vm86_vm0, %v73_v5  ;;  %445 = vmatprep.subr.bf16.mxu0 %v444_v3  ;;  %v463_v35 = vld [vmem:[#allocation8 + $0x4] ss:$16 sps:$4 sm:$0xff]   ;;  %v467_v36 = vld [vmem:[#allocation8 + $0xc] ss:$16 sps:$4 sm:$0xff]   ;;  %v465_v37 = vld [vmem:[#allocation8 + $0x8] ss:$16 sps:$4 sm:$0xff]  }
  0x3b   :  { %447 = vmatpush3.bf16.msra.mxu0 %v444_v3  ;;  %v468_v38 = vld [vmem:[#allocation8] ss:$16 sps:$4 sm:$0xff]   ;;  %300 = vmatprep.subr.bf16.mxu1 %v463_v35  ;;  %v469_v39 = vld [vmem:[#allocation8 + $0x24] ss:$16 sps:$4 sm:$0xff]   ;;  %v473_v40 = vld [vmem:[#allocation8 + $0x2c] ss:$16 sps:$4 sm:$0xff]  }
  0x3c   :  { %449 = vmatprep.subr.bf16.mxu0 %v448_v6  ;;  %301 = vmatpush1.bf16.msra.mxu1 %v468_v38  ;;  %v471_v41 = vld [vmem:[#allocation8 + $0x28] ss:$16 sps:$4 sm:$0xff]   ;;  %v474_v42 = vld [vmem:[#allocation8 + $0x20] ss:$16 sps:$4 sm:$0xff]   ;;  %v238_v0 = vsub.s32 0, %v237_v63  ;;  %v246_v1 = vsub.s32 2, %v237_v63 }
  0x3d   :  { %302 = vmatprep.subr.bf16.mxu1 %v469_v39  ;;  %v416_v56 = vld [vmem:[%s708_s4] ss:$0 sm:$0xff]  ;;  %v242_v3 = vsub.s32 1, %v237_v63  ;;  %v250_v4 = vsub.s32 3, %v237_v63  ;;  %s585_s4 = smov [#allocation9]  }
  0x3e   :  { %v234_v2 = vld [vmem:[%s710_s6] sm:$0xf]  ;;  %s399_s21 = sshll.u32 %s585_s4, 4  ;;  %s400_s21 = int_to_ptr.vmem [resolvable:$true] %s399_s21 }
  0x3f   :  { %451 = vmatpush3.bf16.msra.mxu0 %v448_v6  ;;  %v239_v5 = vrot.slane %v234_v2, %v238_v0  ;;  %v247_v6 = vrot.slane %v234_v2, %v246_v1  ;;  %s549_s6 = scalar_lea.vmem %s400_s21, 1024  ;;  %p554_p11 = scmp.lt.s32.totalorder %s400_s21, %s400_s21 }
  0x40   :  { %343 = vmatprep.subr.bf16.mxu0 %v467_v36  ;;  %303 = vmatpush1.bf16.msra.mxu1 %v474_v42  ;;  %p550_p10 = scmp.ne.s32.totalorder %s400_s21, %s549_s6  ;;  %p555_p12 = scmp.lt.s32.totalorder %s549_s6, %s549_s6 }
  0x42   :  { %442 = vmatmul.mubr.msk.f32.vlgmr.msra.gmra.mrb[0].mxu0 %vm86_vm0, %v74_v7  ;;  %v243_v7 = vrot.slane %v234_v2, %v242_v3  ;;  %p556_p13 = por %p555_p12, %p554_p11 }
  0x43   :  { %344 = vmatpush1.bf16.msra.mxu0 %v465_v37  ;;  %375 = vmatprep.mubr.bf16.mxu0 %v584_v43 }
  0x44   :  { %345 = vmatprep.subr.bf16.mxu0 %v473_v40  ;;  %p557_p0 = pnand %p556_p13, %p550_p10 }
  0x47   :  { %346 = vmatpush1.bf16.msra.mxu0 %v471_v41 }
 0x115   :  { %v443_v9 = vpop.f32.mrb[0].mxu0 }
 0x116   :  { %v165_v10 = vadd.f32 %v443_v9, %v412_v8  ;;  %v159_v11 = vpop.f32.mrb[1].mxu0 }
 0x117   :  { %v160_v12 = vadd.f32 %v412_v8, %v159_v11  ;;  %v251_v8 = vrot.slane %v234_v2, %v250_v4 }
 0x118   :  { %v171_v13 = vmul.f32 0.70710677, %v165_v10  ;;  %v169_v20 = vmul.f32 0.5, %v165_v10 }
 0x119   :  { %v170_v14 = vmul.f32 0.70710677, %v160_v12  ;;  %v168_v17 = vmul.f32 0.5, %v160_v12 }
 0x11a   :  { %475 = verf.f32 %v171_v13 }
 0x11b   :  { %477 = verf.f32 %v170_v14 }
 0x124   :  { %v476_v15 = vpop.eup %475 }
 0x125   :  { %v478_v16 = vpop.eup %477  ;;  %v175_v19 = vadd.f32 1.0, %v476_v15 }
 0x126   :  { %v174_v18 = vadd.f32 1.0, %v478_v16 }
 0x127   :  { %v177_v23 = vmul.f32 %v175_v19, %v169_v20 }
 0x128   :  { %v176_v21 = vmul.f32 %v174_v18, %v168_v17 }
 0x129   :  { %v181_v24 = vsel %vm86_vm0, %v177_v23, 0.0 }
 0x12a   :  { %v178_v22 = vsel %vm86_vm0, %v176_v21, 0.0 }
 0x12b   :  { %179 = vadd.xlane.f32.xlu0 %v178_v22 }
 0x12f   :  { %182 = vadd.xlane.f32.xlu0 %v181_v24 }
 0x1b8   :  { %v180_v25 = vpop.xlane.xlu0 %179 }
 0x1b9   :  { %v185_v26 = vmul.f32 0.03125, %v180_v25 }
 0x1bb   :  { %v187_v27 = vsub.f32 %v176_v21, %v185_v26 }
 0x1bc   :  { %v183_v28 = vpop.xlane.xlu0 %182 }
 0x1bd   :  { %v186_v29 = vmul.f32 0.03125, %v183_v28  ;;  %v189_v30 = vmul.f32 %v187_v27, %v187_v27 }
 0x1bf   :  { %v188_v31 = vsub.f32 %v177_v23, %v186_v29  ;;  %v191_v32 = vsel %vm86_vm0, %v189_v30, 0.0 }
 0x1c0   :  { %192 = vadd.xlane.f32.xlu1 %v191_v32 }
 0x1c1   :  { %v190_v33 = vmul.f32 %v188_v31, %v188_v31 }
 0x1c3   :  { %v194_v34 = vsel %vm86_vm0, %v190_v33, 0.0 }
 0x1c4   :  { %195 = vadd.xlane.f32.xlu1 %v194_v34 }
 0x24d   :  { %v193_v44 = vpop.xlane.xlu1 %192 }
 0x24e   :  { %v197_v45 = vmul.f32 0.03125, %v193_v44 }
 0x250   :  { %v199_v46 = vadd.f32 1e-12, %v197_v45 }
 0x251   :  { %v196_v47 = vpop.xlane.xlu1 %195 }
 0x252   :  { %479 = vrsqrt.f32 %v199_v46  ;;  %v198_v48 = vmul.f32 0.03125, %v196_v47 }
 0x254   :  { %v200_v49 = vadd.f32 1e-12, %v198_v48 }
 0x256   :  { %481 = vrsqrt.f32 %v200_v49 }
 0x25c   :  { %v480_v50 = vpop.eup %479 }
 0x25d   :  { %v203_v51 = vmul.f32 %v480_v50, %v187_v27 }
 0x25f   :  { %v212_v54 = vmul.f32 %v415_v52, %v203_v51 }
 0x260   :  { %v482_v53 = vpop.eup %481 }
 0x261   :  { %v204_v55 = vmul.f32 %v482_v53, %v188_v31  ;;  %v221_v58 = vadd.f32 %v416_v56, %v212_v54 }
 0x263   :  { %v213_v57 = vmul.f32 %v415_v52, %v204_v55 }
 0x265   :  { %v222_v59 = vadd.f32 %v416_v56, %v213_v57 }
 0x267   :  { %v223_v60 = vpack.c.bf16 %v222_v59, %v221_v58 }
 0x269   :  { %224 = vst.msk [vmem:[#allocation2] sm:$0xff] %vm86_vm0, %v223_v60 }
 0x270   :  { %v225_v61 = vld [vmem:[#allocation2] sm:$0xff] }
 0x271   :  { %425 = vmatmul.mubr.msk.bf16.vlgmr.msra.gmra.mrb[0].mxu1 %vm86_vm0, %v225_v61  ;;  %426 = vmatmul.mubr.msk.bf16.vlgmr.msra.gmra.mrb[4].mxu0 %vm86_vm0, %v225_v61 }
 0x344   :  { %v334_v9 = vpop.f32.mrb[0].mxu1  ;;  %v377_v10 = vpop.f32.mrb[4].mxu0 }
 0x345   :  { %v335_v11 = vadd.f32 %v334_v9, %v239_v5  ;;  %v378_v12 = vadd.f32 %v377_v10, %v247_v6  ;;  %v336_v13 = vpop.f32.mrb[1].mxu1  ;;  %v379_v14 = vpop.f32.mrb[5].mxu0 }
 0x346   :  { %v337_v15 = vadd.f32 %v336_v13, %v243_v7  ;;  %v380_v16 = vadd.f32 %v379_v14, %v251_v8  ;;  %v338_v17 = vpop.f32.mrb[2].mxu1  ;;  %v381_v18 = vpop.f32.mrb[6].mxu0 }
 0x347   :  { %386 = vst [vmem:[#allocation9] sm:$0xff] %v335_v11  ;;  %388 = vst [vmem:[#allocation9 + $0x10] sm:$0xff] %v378_v12  ;;  %v339_v19 = vadd.f32 %v338_v17, %v239_v5  ;;  %v382_v20 = vadd.f32 %v381_v18, %v247_v6  ;;  %v340_v21 = vpop.f32.mrb[3].mxu1  ;;  %v383_v22 = vpop.f32.mrb[7].mxu0 }
 0x348   :  { %387 = vst [vmem:[#allocation9 + $0x8] sm:$0xff] %v337_v15  ;;  %389 = vst [vmem:[#allocation9 + $0x18] sm:$0xff] %v380_v16  ;;  %v341_v23 = vadd.f32 %v340_v21, %v243_v7  ;;  %v384_v24 = vadd.f32 %v383_v22, %v251_v8 }
 0x349   :  { %390 = vst [vmem:[#allocation9 + $0x20] sm:$0xff] %v339_v19  ;;  %392 = vst [vmem:[#allocation9 + $0x30] sm:$0xff] %v382_v20 }
 0x34a   :  { %391 = vst [vmem:[#allocation9 + $0x28] sm:$0xff] %v341_v23  ;;  %393 = vst [vmem:[#allocation9 + $0x38] sm:$0xff] %v384_v24 }
 0x34b   :  { %560 = shalt.err (!%p557_p0)
}
 0x34c   :  { %s561_s24 = scalar_lea.hbm %s711_s7, 1024 }
 0x34d   :  { %p562_p1 = scmp.ne.s32.totalorder %s711_s7, %s561_s24  ;;  %p565_p2 = scmp.lt.u32.totalorder %s561_s24, %s711_s7 }
 0x34f   :  { %p567_p3 = pnand %p565_p2, %p562_p1 }
 0x351   :  { %570 = shalt.err (!%p567_p3)
}
 0x352   :  { %s586_s29 = smov 512   ;;  %s587_s30 = smov 32  }
 0x353   :  { %405 = dma.vmem_to_hbm [thread:$0]  %s400_s21, 1024, %s711_s7, [#allocation5], %s586_s29, %s586_s29, %s587_s30  }
 0x354   :  { %575 = dma.done.wait [#allocation5], 1024  }
 0x355   :  { %576 = vsyncadd [#allocation5], 4294966272 }
 0x356   :  { %409 = vsyncpa [#allocation4], 1 }
 0x357   :  { %410 = vsyncpa [#allocation7], 1 }
 0x358   :  { %411 = vsyncpa [#allocation5], 1 }

</bundles_post_ra>
